<compile_context>
chip_gen: v7x
topology: tpu7x:2x2x1
jax: 0.10.0
libtpu: 0.0.40
codegen_flags: <defaults>
</compile_context>

<pallas_src>
import jax
import jax.numpy as jnp
import numpy as np
from jax import lax
from jax.experimental import pallas as pl
from jax.experimental.pallas import tpu as pltpu

LANE = 128


def _fold_bn(gamma, beta, mean, var, eps=1e-5):
    """Eval-mode BatchNorm as per-channel affine: y = x*scale + bias."""
    scale = gamma / jnp.sqrt(var + eps)
    bias = beta - mean * scale
    return scale.astype(jnp.float32), bias.astype(jnp.float32)


def _padded_channels(C, W):
    """Smallest Cp >= C such that the merged lane dim W*Cp is a multiple of 128."""
    if (W * C) % LANE == 0:
        return C
    # TODO(synk): general W (128 % W != 0) would need W-tiling instead of channel padding.
    assert LANE % W == 0, "demo-size helper assumes W divides 128"
    return ((W * C + LANE - 1) // LANE) * LANE // W


def _banded_weights(w_oihw, scale, W, Cp):
    """Fold BN scale into the conv weights, zero-pad channels to Cp, and lay them out as
    3 banded matmul slabs B of shape (3, W*Cp, W*Cp) with
        B[ky, (w + kx - 1)*Cp + ci, w*Cp + co] = scale[co] * w[co, ci, ky, kx]
    (entries whose source pixel w+kx-1 falls outside [0, W) are absent -> 'same' width
    padding for free).  With this layout a 3x3 conv over the lane-merged slab is 3 dense
    MXU matmuls (one per ky).  Runs once per parameter set, outside the jitted forward.
    """
    w_hwio = jnp.transpose(w_oihw, (2, 3, 1, 0)).astype(jnp.float32)       # (3,3,Cin,Cout)
    w_hwio = w_hwio * scale[None, None, None, :]
    kh, kw, Cin, Cout = w_hwio.shape
    w_pad = jnp.zeros((kh, kw, Cp, Cp), jnp.float32).at[:, :, :Cin, :Cout].set(w_hwio)
    bands = []
    for ky in range(kh):
        t = jnp.zeros((W, Cp, W, Cp), jnp.float32)
        for kx in range(kw):
            shift_eye = jnp.eye(W, W, k=1 - kx, dtype=jnp.float32)         # [w+kx-1, w] = 1
            t = t + shift_eye[:, None, :, None] * w_pad[ky, kx][None, :, None, :]
        bands.append(t.reshape(W * Cp, W * Cp))
    return jnp.stack(bands)                                                # (3, W*Cp, W*Cp)


def prepare_residual_params(params, W):
    """One-time parameter prep (layout plumbing): BN fold + banded weights + tiled biases."""
    C = params["w1"].shape[0]
    assert params["w1"].shape[0] == params["w2"].shape[0] == params["w2"].shape[1] == C
    Cp = _padded_channels(C, W)
    s1, bias1 = _fold_bn(params["g1"], params["b1"], params["m1"], params["v1"])
    s2, bias2 = _fold_bn(params["g2"], params["b2"], params["m2"], params["v2"])
    w1b = _banded_weights(params["w1"], s1, W, Cp)             # (3, W*Cp, W*Cp)
    w2b = _banded_weights(params["w2"], s2, W, Cp)
    b1p = jnp.zeros((Cp,), jnp.float32).at[:C].set(bias1)
    b2p = jnp.zeros((Cp,), jnp.float32).at[:C].set(bias2)
    b1t = jnp.tile(b1p, (W,)).reshape(1, W * Cp)               # bias tiled per merged lane
    b2t = jnp.tile(b2p, (W,)).reshape(1, W * Cp)
    return dict(w1b=w1b, b1t=b1t, w2b=w2b, b2t=b2t)


def residual_forward(x_nchw, prepped):
    """out = fn(x) + x, fn = double Conv3x3 -> BN(eval) -> ReLU.  NCHW f32 in/out."""
    N, C, H, W = x_nchw.shape
    WCp = prepped["w1b"].shape[1]
    Cp = WCp // W
    NH = N * H

    # NCHW -> NHWC -> zero-pad channels to Cp -> lane-dense (N*H, W*Cp) slab.
    x_nhwc = jnp.transpose(x_nchw, (0, 2, 3, 1)).astype(jnp.float32)
    if Cp != C:
        x_nhwc = jnp.pad(x_nhwc, ((0, 0), (0, 0), (0, 0), (0, Cp - C)))
    x_slab = x_nhwc.reshape(NH, WCp)

    def kernel(x_ref, w1_ref, b1_ref, w2_ref, b2_ref, o_ref):
        x = x_ref[...]                                          # (NH, WCp), lane-dense load

        # Per-row "height within image" index; masks for the conv halo rows.  Built once,
        # reused by both convs (sublane iota broadcast along lanes -> cheap VPU work).
        row_in_img = lax.broadcasted_iota(jnp.int32, (NH, WCp), 0) % H
        top_mask = row_in_img == 0                              # ky=0 tap out of range
        bot_mask = row_in_img == H - 1                          # ky=2 tap out of range

        def conv_bn_relu(y, w_ref, b_ref):
            # 3x3 conv == 3 dense MXU matmuls against the banded weight slabs; kx taps +
            # channel contraction + BN scale are folded into K = W*Cp.
            acc = jnp.dot(y, w_ref[1], preferred_element_type=jnp.float32)    # ky=1 (center)
            # ky=0 tap: source row h-1 -> cyclic sublane roll down by 1, zero wrapped rows.
            y_up = jnp.where(top_mask, 0.0, pltpu.roll(y, shift=1, axis=0))
            acc = acc + jnp.dot(y_up, w_ref[0], preferred_element_type=jnp.float32)
            # ky=2 tap: source row h+1 -> cyclic roll up by 1 (positive shift NH-1).
            y_dn = jnp.where(bot_mask, 0.0, pltpu.roll(y, shift=NH - 1, axis=0))
            acc = acc + jnp.dot(y_dn, w_ref[2], preferred_element_type=jnp.float32)
            return jnp.maximum(acc + b_ref[...], 0.0)           # fused BN bias + ReLU

        y1 = conv_bn_relu(x, w1_ref, b1_ref)                    # block 1 (stays in registers)
        y2 = conv_bn_relu(y1, w2_ref, b2_ref)                   # block 2
        o_ref[...] = (y2 + x).astype(o_ref.dtype)               # Residual: fn(x) + x

    out_slab = pl.pallas_call(
        kernel,
        out_shape=jax.ShapeDtypeStruct((NH, WCp), jnp.float32),
        grid=(1,),                                 # whole (small) problem in one fused step
        in_specs=[
            pl.BlockSpec((NH, WCp), lambda i: (0, 0)),
            pl.BlockSpec((3, WCp, WCp), lambda i: (0, 0, 0)),
            pl.BlockSpec((1, WCp), lambda i: (0, 0)),
            pl.BlockSpec((3, WCp, WCp), lambda i: (0, 0, 0)),
            pl.BlockSpec((1, WCp), lambda i: (0, 0)),
        ],
        out_specs=pl.BlockSpec((NH, WCp), lambda i: (0, 0)),
        input_output_aliases={0: 0},               # output reuses the x-slab HBM buffer
        compiler_params=pltpu.CompilerParams(dimension_semantics=("arbitrary",)),
    )(x_slab, prepped["w1b"], prepped["b1t"], prepped["w2b"], prepped["b2t"])

    out = out_slab.reshape(N, H, W, Cp)[..., :C]                # drop channel padding
    return jnp.transpose(out, (0, 3, 1, 2)).astype(x_nchw.dtype)  # back to NCHW


def _reference_forward(x_nchw, params, eps=1e-5):
    """Pure-JAX reference: Residual(double Conv3x3 -> BN(eval) -> ReLU)."""
    def block(x, w, g, b, m, v):
        y = lax.conv_general_dilated(
            x, w, window_strides=(1, 1), padding=((1, 1), (1, 1)),
            dimension_numbers=("NCHW", "OIHW", "NCHW"))
        y = (y - m[None, :, None, None]) / jnp.sqrt(v[None, :, None, None] + eps)
        y = y * g[None, :, None, None] + b[None, :, None, None]
        return jnp.maximum(y, 0.0)

    y = block(x_nchw, params["w1"], params["g1"], params["b1"], params["m1"], params["v1"])
    y = block(y,       params["w2"], params["g2"], params["b2"], params["m2"], params["v2"])
    return y + x_nchw                                           # Residual


def init_params(key, channels):
    ks = jax.random.split(key, 8)
    fan = channels * 9
    w1 = jax.random.normal(ks[0], (channels, channels, 3, 3), jnp.float32) / np.sqrt(fan)
    w2 = jax.random.normal(ks[1], (channels, channels, 3, 3), jnp.float32) / np.sqrt(fan)
    g1 = 1.0 + 0.1 * jax.random.normal(ks[2], (channels,), jnp.float32)
    b1 = 0.1 * jax.random.normal(ks[3], (channels,), jnp.float32)
    m1 = 0.05 * jax.random.normal(ks[4], (channels,), jnp.float32)
    v1 = 1.0 + 0.1 * jax.random.uniform(ks[5], (channels,), jnp.float32)
    g2 = 1.0 + 0.1 * jax.random.normal(ks[6], (channels,), jnp.float32)
    b2 = 0.1 * jax.random.normal(ks[7], (channels,), jnp.float32)
    m2 = jnp.zeros((channels,), jnp.float32)
    v2 = jnp.ones((channels,), jnp.float32)
    return dict(w1=w1, g1=g1, b1=b1, m1=m1, v1=v1,
                w2=w2, g2=g2, b2=b2, m2=m2, v2=v2)


if __name__ == "__main__":
    key = jax.random.PRNGKey(0)
    k_x, k_p = jax.random.split(key)

    N, C, H, W = 2, 4, 16, 16
    x = jax.random.normal(k_x, (N, C, H, W), jnp.float32)
    params = init_params(k_p, C)

    # Parameter prep runs once, outside the per-call jit path.
    prepped = prepare_residual_params(params, W)

    fwd = jax.jit(residual_forward)
    out = jax.block_until_ready(fwd(x, prepped))
    ref = jax.block_until_ready(_reference_forward(x, params))

    assert out.shape == (N, C, H, W)
    np.testing.assert_allclose(np.asarray(out), np.asarray(ref), rtol=1e-4, atol=1e-4)
    print("KERNEL_OK")
</pallas_src>

<mosaic_0001>
module attributes {stable_mosaic.version = 11 : i64} {
  func.func @kernel(%arg0: i32, %arg1: memref<32x128xf32, #tpu.memory_space<vmem>>, %arg2: memref<3x128x128xf32, #tpu.memory_space<vmem>>, %arg3: memref<1x128xf32, #tpu.memory_space<vmem>>, %arg4: memref<3x128x128xf32, #tpu.memory_space<vmem>>, %arg5: memref<1x128xf32, #tpu.memory_space<vmem>>, %arg6: memref<32x128xf32, #tpu.memory_space<vmem>>) attributes {dimension_semantics = [#tpu.dimension_semantics<arbitrary>], iteration_bounds = array<i64: 1>, scalar_prefetch = 0 : i64, scratch_operands = 0 : i64, tpu.core_type = #tpu.core_type<tc>, window_params = [{pipeline_mode = #tpu.pipeline_mode<synchronous>, transform_indices = @transform_0, window_bounds = array<i64: 32, 128>}, {pipeline_mode = #tpu.pipeline_mode<synchronous>, transform_indices = @transform_1, window_bounds = array<i64: 3, 128, 128>}, {pipeline_mode = #tpu.pipeline_mode<synchronous>, transform_indices = @transform_2, window_bounds = array<i64: 1, 128>}, {pipeline_mode = #tpu.pipeline_mode<synchronous>, transform_indices = @transform_3, window_bounds = array<i64: 3, 128, 128>}, {pipeline_mode = #tpu.pipeline_mode<synchronous>, transform_indices = @transform_4, window_bounds = array<i64: 1, 128>}, {pipeline_mode = #tpu.pipeline_mode<synchronous>, transform_indices = @transform_5, window_bounds = array<i64: 32, 128>}]} {
    %c0 = arith.constant 0 : index
    %c0_0 = arith.constant 0 : index
    %0 = vector.load %arg1[%c0, %c0_0] : memref<32x128xf32, #tpu.memory_space<vmem>>, vector<32x128xf32>
    %1 = tpu.iota {dimensions = array<i32: 0>} : vector<32x128xi32>
    %c16_i32 = arith.constant 16 : i32
    %c0_i32 = arith.constant 0 : i32
    %2 = arith.cmpi eq, %c16_i32, %c0_i32 : i32
    %c1_i32 = arith.constant 1 : i32
    %3 = arith.select %2, %c1_i32, %c16_i32 : i32
    %4 = vector.broadcast %3 : i32 to vector<32x128xi32>
    %5 = arith.remsi %1, %4 : vector<32x128xi32>
    %c0_i32_1 = arith.constant 0 : i32
    %6 = vector.broadcast %c0_i32_1 : i32 to vector<32x128xi32>
    %7 = arith.cmpi ne, %5, %6 : vector<32x128xi32>
    %c0_i32_2 = arith.constant 0 : i32
    %8 = vector.broadcast %c0_i32_2 : i32 to vector<32x128xi32>
    %9 = arith.cmpi slt, %5, %8 : vector<32x128xi32>
    %c0_i32_3 = arith.constant 0 : i32
    %10 = arith.cmpi slt, %3, %c0_i32_3 : i32
    %11 = vector.broadcast %10 : i1 to vector<32x128xi1>
    %12 = vector.broadcast %11 : vector<32x128xi1> to vector<32x128xi1>
    %13 = arith.xori %9, %12 : vector<32x128xi1>
    %14 = arith.andi %13, %7 : vector<32x128xi1>
    %15 = vector.broadcast %3 : i32 to vector<32x128xi32>
    %16 = arith.addi %5, %15 : vector<32x128xi32>
    %17 = arith.select %14, %16, %5 : vector<32x128xi1>, vector<32x128xi32>
    %c0_i32_4 = arith.constant 0 : i32
    %18 = vector.broadcast %c0_i32_4 : i32 to vector<32x128xi32>
    %19 = arith.cmpi eq, %17, %18 : vector<32x128xi32>
    %c15_i32 = arith.constant 15 : i32
    %20 = vector.broadcast %c15_i32 : i32 to vector<32x128xi32>
    %21 = arith.cmpi eq, %17, %20 : vector<32x128xi32>
    %c1 = arith.constant 1 : index
    %c0_5 = arith.constant 0 : index
    %c0_6 = arith.constant 0 : index
    %22 = vector.load %arg2[%c1, %c0_5, %c0_6] : memref<3x128x128xf32, #tpu.memory_space<vmem>>, vector<1x128x128xf32>
    %23 = vector.shape_cast %22 : vector<1x128x128xf32> to vector<128x128xf32>
    %cst = arith.constant dense<0.000000e+00> : vector<32x128xf32>
    %24 = tpu.matmul %0, %23, %cst {dimension_numbers = #tpu.dot_dimension_numbers<[1], [0], [0], [1], [0, 0, 1, 1], [], []>} : vector<32x128xf32>, vector<128x128xf32>, vector<32x128xf32> -> vector<32x128xf32>
    %c1_i32_7 = arith.constant 1 : i32
    %25 = tpu.dynamic_rotate %0 by %c1_i32_7 dim 0 : vector<32x128xf32>, i32 -> vector<32x128xf32>
    %cst_8 = arith.constant 0.000000e+00 : f32
    %26 = vector.broadcast %cst_8 : f32 to vector<32x128xf32>
    %27 = arith.select %19, %26, %25 : vector<32x128xi1>, vector<32x128xf32>
    %c0_9 = arith.constant 0 : index
    %c0_10 = arith.constant 0 : index
    %c0_11 = arith.constant 0 : index
    %28 = vector.load %arg2[%c0_9, %c0_10, %c0_11] : memref<3x128x128xf32, #tpu.memory_space<vmem>>, vector<1x128x128xf32>
    %29 = vector.shape_cast %28 : vector<1x128x128xf32> to vector<128x128xf32>
    %cst_12 = arith.constant dense<0.000000e+00> : vector<32x128xf32>
    %30 = tpu.matmul %27, %29, %cst_12 {dimension_numbers = #tpu.dot_dimension_numbers<[1], [0], [0], [1], [0, 0, 1, 1], [], []>} : vector<32x128xf32>, vector<128x128xf32>, vector<32x128xf32> -> vector<32x128xf32>
    %31 = arith.addf %24, %30 : vector<32x128xf32>
    %c31_i32 = arith.constant 31 : i32
    %32 = tpu.dynamic_rotate %0 by %c31_i32 dim 0 : vector<32x128xf32>, i32 -> vector<32x128xf32>
    %cst_13 = arith.constant 0.000000e+00 : f32
    %33 = vector.broadcast %cst_13 : f32 to vector<32x128xf32>
    %34 = arith.select %21, %33, %32 : vector<32x128xi1>, vector<32x128xf32>
    %c2 = arith.constant 2 : index
    %c0_14 = arith.constant 0 : index
    %c0_15 = arith.constant 0 : index
    %35 = vector.load %arg2[%c2, %c0_14, %c0_15] : memref<3x128x128xf32, #tpu.memory_space<vmem>>, vector<1x128x128xf32>
    %36 = vector.shape_cast %35 : vector<1x128x128xf32> to vector<128x128xf32>
    %cst_16 = arith.constant dense<0.000000e+00> : vector<32x128xf32>
    %37 = tpu.matmul %34, %36, %cst_16 {dimension_numbers = #tpu.dot_dimension_numbers<[1], [0], [0], [1], [0, 0, 1, 1], [], []>} : vector<32x128xf32>, vector<128x128xf32>, vector<32x128xf32> -> vector<32x128xf32>
    %38 = arith.addf %31, %37 : vector<32x128xf32>
    %c0_17 = arith.constant 0 : index
    %c0_18 = arith.constant 0 : index
    %39 = vector.load %arg3[%c0_17, %c0_18] : memref<1x128xf32, #tpu.memory_space<vmem>>, vector<1x128xf32>
    %40 = vector.broadcast %39 : vector<1x128xf32> to vector<32x128xf32>
    %41 = arith.addf %38, %40 : vector<32x128xf32>
    %cst_19 = arith.constant 0.000000e+00 : f32
    %42 = vector.broadcast %cst_19 : f32 to vector<32x128xf32>
    %43 = arith.maximumf %41, %42 : vector<32x128xf32>
    %c1_20 = arith.constant 1 : index
    %c0_21 = arith.constant 0 : index
    %c0_22 = arith.constant 0 : index
    %44 = vector.load %arg4[%c1_20, %c0_21, %c0_22] : memref<3x128x128xf32, #tpu.memory_space<vmem>>, vector<1x128x128xf32>
    %45 = vector.shape_cast %44 : vector<1x128x128xf32> to vector<128x128xf32>
    %cst_23 = arith.constant dense<0.000000e+00> : vector<32x128xf32>
    %46 = tpu.matmul %43, %45, %cst_23 {dimension_numbers = #tpu.dot_dimension_numbers<[1], [0], [0], [1], [0, 0, 1, 1], [], []>} : vector<32x128xf32>, vector<128x128xf32>, vector<32x128xf32> -> vector<32x128xf32>
    %c1_i32_24 = arith.constant 1 : i32
    %47 = tpu.dynamic_rotate %43 by %c1_i32_24 dim 0 : vector<32x128xf32>, i32 -> vector<32x128xf32>
    %cst_25 = arith.constant 0.000000e+00 : f32
    %48 = vector.broadcast %cst_25 : f32 to vector<32x128xf32>
    %49 = arith.select %19, %48, %47 : vector<32x128xi1>, vector<32x128xf32>
    %c0_26 = arith.constant 0 : index
    %c0_27 = arith.constant 0 : index
    %c0_28 = arith.constant 0 : index
    %50 = vector.load %arg4[%c0_26, %c0_27, %c0_28] : memref<3x128x128xf32, #tpu.memory_space<vmem>>, vector<1x128x128xf32>
    %51 = vector.shape_cast %50 : vector<1x128x128xf32> to vector<128x128xf32>
    %cst_29 = arith.constant dense<0.000000e+00> : vector<32x128xf32>
    %52 = tpu.matmul %49, %51, %cst_29 {dimension_numbers = #tpu.dot_dimension_numbers<[1], [0], [0], [1], [0, 0, 1, 1], [], []>} : vector<32x128xf32>, vector<128x128xf32>, vector<32x128xf32> -> vector<32x128xf32>
    %53 = arith.addf %46, %52 : vector<32x128xf32>
    %c31_i32_30 = arith.constant 31 : i32
    %54 = tpu.dynamic_rotate %43 by %c31_i32_30 dim 0 : vector<32x128xf32>, i32 -> vector<32x128xf32>
    %cst_31 = arith.constant 0.000000e+00 : f32
    %55 = vector.broadcast %cst_31 : f32 to vector<32x128xf32>
    %56 = arith.select %21, %55, %54 : vector<32x128xi1>, vector<32x128xf32>
    %c2_32 = arith.constant 2 : index
    %c0_33 = arith.constant 0 : index
    %c0_34 = arith.constant 0 : index
    %57 = vector.load %arg4[%c2_32, %c0_33, %c0_34] : memref<3x128x128xf32, #tpu.memory_space<vmem>>, vector<1x128x128xf32>
    %58 = vector.shape_cast %57 : vector<1x128x128xf32> to vector<128x128xf32>
    %cst_35 = arith.constant dense<0.000000e+00> : vector<32x128xf32>
    %59 = tpu.matmul %56, %58, %cst_35 {dimension_numbers = #tpu.dot_dimension_numbers<[1], [0], [0], [1], [0, 0, 1, 1], [], []>} : vector<32x128xf32>, vector<128x128xf32>, vector<32x128xf32> -> vector<32x128xf32>
    %60 = arith.addf %53, %59 : vector<32x128xf32>
    %c0_36 = arith.constant 0 : index
    %c0_37 = arith.constant 0 : index
    %61 = vector.load %arg5[%c0_36, %c0_37] : memref<1x128xf32, #tpu.memory_space<vmem>>, vector<1x128xf32>
    %62 = vector.broadcast %61 : vector<1x128xf32> to vector<32x128xf32>
    %63 = arith.addf %60, %62 : vector<32x128xf32>
    %cst_38 = arith.constant 0.000000e+00 : f32
    %64 = vector.broadcast %cst_38 : f32 to vector<32x128xf32>
    %65 = arith.maximumf %63, %64 : vector<32x128xf32>
    %66 = arith.addf %65, %0 : vector<32x128xf32>
    %c0_39 = arith.constant 0 : index
    %c0_40 = arith.constant 0 : index
    %67 = vector.load %arg6[%c0_39, %c0_40] : memref<32x128xf32, #tpu.memory_space<vmem>>, vector<32x128xf32>
    tpu.vector_store %arg6[%c0_39, %c0_40], %66 {strides = array<i32>} : memref<32x128xf32, #tpu.memory_space<vmem>>, vector<32x128xf32>,
    return
  }
  func.func @transform_0(%arg0: i32) -> (i32, i32) {
    %c0_i32 = arith.constant 0 : i32
    %c0_i32_0 = arith.constant 0 : i32
    %c0_i32_1 = arith.constant 0 : i32
    return %c0_i32, %c0_i32_0 : i32, i32
  }
  func.func @transform_1(%arg0: i32) -> (i32, i32, i32) {
    %c0_i32 = arith.constant 0 : i32
    %c0_i32_0 = arith.constant 0 : i32
    %c0_i32_1 = arith.constant 0 : i32
    %c0_i32_2 = arith.constant 0 : i32
    return %c0_i32, %c0_i32_0, %c0_i32_1 : i32, i32, i32
  }
  func.func @transform_2(%arg0: i32) -> (i32, i32) {
    %c0_i32 = arith.constant 0 : i32
    %c0_i32_0 = arith.constant 0 : i32
    %c0_i32_1 = arith.constant 0 : i32
    return %c0_i32, %c0_i32_0 : i32, i32
  }
  func.func @transform_3(%arg0: i32) -> (i32, i32, i32) {
    %c0_i32 = arith.constant 0 : i32
    %c0_i32_0 = arith.constant 0 : i32
    %c0_i32_1 = arith.constant 0 : i32
    %c0_i32_2 = arith.constant 0 : i32
    return %c0_i32, %c0_i32_0, %c0_i32_1 : i32, i32, i32
  }
  func.func @transform_4(%arg0: i32) -> (i32, i32) {
    %c0_i32 = arith.constant 0 : i32
    %c0_i32_0 = arith.constant 0 : i32
    %c0_i32_1 = arith.constant 0 : i32
    return %c0_i32, %c0_i32_0 : i32, i32
  }
  func.func @transform_5(%arg0: i32) -> (i32, i32) {
    %c0_i32 = arith.constant 0 : i32
    %c0_i32_0 = arith.constant 0 : i32
    %c0_i32_1 = arith.constant 0 : i32
    return %c0_i32, %c0_i32_0 : i32, i32
  }
}

</mosaic_0001>

<bundles_post_ra>
// kernel: residual_forward.1
= control target key start
LH: loop header
LB: loop body
LE: loop exit
PB: predicated region body
PF: predicated region fallthrough
CT: control target
= control target key end

     0   :  { %v24_v0 = vlaneseq  ;;  %s1916_s1 = inlined_call_operand.vmem [shape: f32[3,128,128], index: 1, kind: input, shape index: {}]   ;;  %s1917_s0 = inlined_call_operand.vmem [shape: f32[32,128], index: 0, kind: input, shape index: {}, may-alias: {0,5}]   ;;  %s1918_s3 = inlined_call_operand.vmem [shape: f32[3,128,128], index: 3, kind: input, shape index: {}]   ;;  %s1919_s2 = inlined_call_operand.vmem [shape: f32[1,128], index: 2, kind: input, shape index: {}]   ;;  %s1920_s4 = inlined_call_operand.vmem [shape: f32[1,128], index: 4, kind: input, shape index: {}]   ;;  %s1921_s5 = inlined_call_operand.vmem [shape: f32[32,128], index: 5, kind: output, shape index: {}, may-alias: {0,5}]  }
   0x1   :  { %v115_v1 = vld [vmem:[%s1916_s1] sm:$0xff]  ;;  %v116_v2 = vld [vmem:[%s1916_s1 + $0x8] sm:$0xff]  ;;  %v117_v3 = vld [vmem:[%s1916_s1 + $0x10] sm:$0xff] }
   0x2   :  { %v1229_v4 = vpack.c.bf16 %v116_v2, %v115_v1  ;;  %v118_v5 = vld [vmem:[%s1916_s1 + $0x18] sm:$0xff]  ;;  %v1479_v6 = vshrl.u32 %v24_v0, 7  ;;  %v119_v8 = vld [vmem:[%s1916_s1 + $0x20] sm:$0xff]  ;;  %v120_v9 = vld [vmem:[%s1916_s1 + $0x28] sm:$0xff] }
   0x3   :  { %v1233_v7 = vpack.c.bf16 %v118_v5, %v117_v3  ;;  %v1237_v11 = vpack.c.bf16 %v120_v9, %v119_v8  ;;  %v1491_v12 = vld [vmem:[%s1917_s0] sm:$0xff]  ;;  %v1496_v13 = vld [vmem:[%s1917_s0 + $0x18] sm:$0xff]  ;;  %v121_v14 = vld [vmem:[%s1916_s1 + $0x30] sm:$0xff] }
   0x4   :  { %1230 = vmatprep.subr.bf16.mxu0 %v1229_v4  ;;  %v33_v10 = vand.u32 15, %v1479_v6  ;;  %vm106_vm0 = vcmp.lt.s32.totalorder %v1479_v6, 1  ;;  %v122_v15 = vld [vmem:[%s1916_s1 + $0x38] sm:$0xff]  ;;  %v102_v16 = vrot.slane %v1491_v12, 7  ;;  %v105_v17 = vrot.slane %v1496_v13, 7  ;;  %v123_v21 = vld [vmem:[%s1916_s1 + $0x40] sm:$0xff] }
   0x5   :  { %1232 = vmatpush3.bf16.msra.mxu0 %v1229_v4  ;;  %v1241_v20 = vpack.c.bf16 %v122_v15, %v121_v14  ;;  %v124_v22 = vld [vmem:[%s1916_s1 + $0x48] sm:$0xff]  ;;  %v125_v24 = vld [vmem:[%s1916_s1 + $0x50] sm:$0xff]  ;;  %v126_v25 = vld [vmem:[%s1916_s1 + $0x58] sm:$0xff]  ;;  %v27_v45 = vadd.s32 16, %v1479_v6  ;;  %vm305_vm3 = vcmp.lt.s32.totalorder %v1479_v6, 7 }
   0x6   :  { %1234 = vmatprep.subr.bf16.mxu0 %v1233_v7  ;;  %vm1507_vm1 = vcmp.ne.s32.totalorder %v33_v10, 0  ;;  %v110_v19 = vsel %vm106_vm0, %v105_v17, %v102_v16  ;;  %v1245_v23 = vpack.c.bf16 %v124_v22, %v123_v21  ;;  %v1249_v26 = vpack.c.bf16 %v126_v25, %v125_v24  ;;  %v127_v27 = vld [vmem:[%s1916_s1 + $0x60] sm:$0xff]  ;;  %v465_v29 = vld [vmem:[%s1918_s3 + $0x8] sm:$0xff]  ;;  %v466_v32 = vld [vmem:[%s1918_s3 + $0x10] sm:$0xff] }
   0x7   :  { %1033 = vmatprep.mubr.msk.f32.mxu0 %vm1507_vm1, %v110_v19  ;;  %v464_v28 = vld [vmem:[%s1918_s3] sm:$0xff]  ;;  %v128_v30 = vld [vmem:[%s1916_s1 + $0x68] sm:$0xff]  ;;  %v467_v33 = vld [vmem:[%s1918_s3 + $0x18] sm:$0xff]  ;;  %v47_v54 = vand.u32 15, %v27_v45 }
   0x8   :  { %v1325_v31 = vpack.c.bf16 %v465_v29, %v464_v28  ;;  %v1329_v34 = vpack.c.bf16 %v467_v33, %v466_v32  ;;  %v468_v35 = vld [vmem:[%s1918_s3 + $0x20] sm:$0xff]  ;;  %v469_v36 = vld [vmem:[%s1918_s3 + $0x28] sm:$0xff]  ;;  %v1253_v37 = vpack.c.bf16 %v128_v30, %v127_v27  ;;  %v129_v38 = vld [vmem:[%s1916_s1 + $0x70] sm:$0xff]  ;;  %v301_v28 = vrot.slane %v1491_v12, 1 }
   0x9   :  { %1236 = vmatpush3.bf16.msra.mxu0 %v1233_v7  ;;  %v130_v39 = vld [vmem:[%s1916_s1 + $0x78] sm:$0xff]  ;;  %v1333_v40 = vpack.c.bf16 %v469_v36, %v468_v35  ;;  %v470_v41 = vld [vmem:[%s1918_s3 + $0x30] sm:$0xff]  ;;  %v1570_v44 = vld [vmem:[%s1917_s0 + $0x8] sm:$0xff]  ;;  %vm1604_vm2 = vcmp.ne.s32.totalorder %v47_v54, 0  ;;  %v28_v54 = vadd.s32 24, %v1479_v6 }
   0xa   :  { %1238 = vmatprep.subr.bf16.mxu0 %v1237_v11  ;;  %1326 = vmatprep.subr.bf16.mxu1 %v1325_v31  ;;  %v471_v42 = vld [vmem:[%s1918_s3 + $0x38] sm:$0xff]  ;;  %v1257_v43 = vpack.c.bf16 %v130_v39, %v129_v38  ;;  %v795_v46 = vld [vmem:[%s1916_s1 + $0x80] sm:$0xff]  ;;  %v796_v47 = vld [vmem:[%s1916_s1 + $0x88] sm:$0xff]  ;;  %v103_v52 = vrot.slane %v1570_v44, 7  ;;  %v302_v29 = vrot.slane %v1570_v44, 1 }
   0xb   :  { %1328 = vmatpush3.bf16.msra.mxu1 %v1325_v31  ;;  %v1582_v48 = vld [vmem:[%s1917_s0 + $0x10] sm:$0xff]  ;;  %v1337_v49 = vpack.c.bf16 %v471_v42, %v470_v41  ;;  %v472_v50 = vld [vmem:[%s1918_s3 + $0x40] sm:$0xff]  ;;  %v473_v51 = vld [vmem:[%s1918_s3 + $0x48] sm:$0xff]  ;;  %v1261_v53 = vpack.c.bf16 %v796_v47, %v795_v46 }
   0xc   :  { %1330 = vmatprep.subr.bf16.mxu1 %v1329_v34  ;;  %v104_v55 = vrot.slane %v1582_v48, 7  ;;  %v797_v56 = vld [vmem:[%s1916_s1 + $0x90] sm:$0xff]  ;;  %v798_v57 = vld [vmem:[%s1916_s1 + $0x98] sm:$0xff]  ;;  %v1341_v58 = vpack.c.bf16 %v473_v51, %v472_v50  ;;  %v109_v59 = vsel %vm106_vm0, %v102_v16, %v103_v52  ;;  %v799_v63 = vld [vmem:[%s1916_s1 + $0xa0] sm:$0xff]  ;;  %v308_v33 = vsel %vm305_vm3, %v301_v28, %v302_v29 }
   0xd   :  { %1240 = vmatpush3.bf16.msra.mxu0 %v1237_v11  ;;  %v1265_v60 = vpack.c.bf16 %v798_v57, %v797_v56  ;;  %v800_v0 = vld [vmem:[%s1916_s1 + $0xa8] sm:$0xff]  ;;  %v801_v3 = vld [vmem:[%s1916_s1 + $0xb0] sm:$0xff]  ;;  %v802_v4 = vld [vmem:[%s1916_s1 + $0xb8] sm:$0xff]  ;;  %v26_v50 = vadd.s32 8, %v1479_v6 }
   0xe   :  { %1242 = vmatprep.subr.bf16.mxu0 %v1241_v20  ;;  %v108_v61 = vsel %vm106_vm0, %v103_v52, %v104_v55  ;;  %v107_v1 = vsel %vm106_vm0, %v104_v55, %v105_v17  ;;  %v1269_v2 = vpack.c.bf16 %v800_v0, %v799_v63  ;;  %v1273_v5 = vpack.c.bf16 %v802_v4, %v801_v3  ;;  %v803_v7 = vld [vmem:[%s1916_s1 + $0xc0] sm:$0xff]  ;;  %v804_v8 = vld [vmem:[%s1916_s1 + $0xc8] sm:$0xff]  ;;  %v805_v10 = vld [vmem:[%s1916_s1 + $0xd0] sm:$0xff] }
   0xf   :  { %1332 = vmatpush3.bf16.msra.mxu1 %v1329_v34  ;;  %v1277_v9 = vpack.c.bf16 %v804_v8, %v803_v7  ;;  %v806_v11 = vld [vmem:[%s1916_s1 + $0xd8] sm:$0xff]  ;;  %v807_v15 = vld [vmem:[%s1916_s1 + $0xe0] sm:$0xff]  ;;  %v808_v16 = vld [vmem:[%s1916_s1 + $0xe8] sm:$0xff]  ;;  %v40_v52 = vand.u32 15, %v26_v50  ;;  %v304_v55 = vrot.slane %v1496_v13, 1 }
  0x10   :  { %1334 = vmatprep.subr.bf16.mxu1 %v1333_v40  ;;  %v1281_v14 = vpack.c.bf16 %v806_v11, %v805_v10  ;;  %v1285_v17 = vpack.c.bf16 %v808_v16, %v807_v15  ;;  %v809_v19 = vld [vmem:[%s1916_s1 + $0xf0] sm:$0xff]  ;;  %v815_v22 = vld [vmem:[%s1916_s1 + $0x100] sm:$0xff]  ;;  %v820_v31 = vld [vmem:[%s1916_s1 + $0x128] sm:$0xff] }
  0x11   :  { %1244 = vmatpush3.bf16.msra.mxu0 %v1241_v20  ;;  %v810_v20 = vld [vmem:[%s1916_s1 + $0xf8] sm:$0xff]  ;;  %v817_v25 = vld [vmem:[%s1916_s1 + $0x110] sm:$0xff]  ;;  %v819_v30 = vld [vmem:[%s1916_s1 + $0x120] sm:$0xff]  ;;  %vm1713_vm4 = vcmp.ne.s32.totalorder %v40_v52, 15 }
  0x12   :  { %1246 = vmatprep.subr.bf16.mxu0 %v1245_v23  ;;  %v1289_v21 = vpack.c.bf16 %v810_v20, %v809_v19  ;;  %v1301_v32 = vpack.c.bf16 %v820_v31, %v819_v30  ;;  %v821_v34 = vld [vmem:[%s1916_s1 + $0x130] sm:$0xff]  ;;  %v822_v35 = vld [vmem:[%s1916_s1 + $0x138] sm:$0xff]  ;;  %v824_v38 = vld [vmem:[%s1916_s1 + $0x148] sm:$0xff] }
  0x13   :  { %1336 = vmatpush3.bf16.msra.mxu1 %v1333_v40  ;;  %v1305_v36 = vpack.c.bf16 %v822_v35, %v821_v34  ;;  %v825_v40 = vld [vmem:[%s1916_s1 + $0x150] sm:$0xff]  ;;  %v826_v41 = vld [vmem:[%s1916_s1 + $0x158] sm:$0xff]  ;;  %v828_v45 = vld [vmem:[%s1916_s1 + $0x168] sm:$0xff] }
  0x14   :  { %1338 = vmatprep.subr.bf16.mxu1 %v1337_v49  ;;  %v1313_v42 = vpack.c.bf16 %v826_v41, %v825_v40  ;;  %v829_v47 = vld [vmem:[%s1916_s1 + $0x170] sm:$0xff]  ;;  %v475_v0 = vld [vmem:[%s1918_s3 + $0x58] sm:$0xff]  ;;  %v477_v3 = vld [vmem:[%s1918_s3 + $0x68] sm:$0xff] }
  0x15   :  { %1248 = vmatpush3.bf16.msra.mxu0 %v1245_v23  ;;  %v816_v23 = vld [vmem:[%s1916_s1 + $0x108] sm:$0xff]  ;;  %v474_v63 = vld [vmem:[%s1918_s3 + $0x50] sm:$0xff]  ;;  %v479_v7 = vld [vmem:[%s1918_s3 + $0x78] sm:$0xff] }
  0x16   :  { %1250 = vmatprep.subr.bf16.mxu0 %v1249_v26  ;;  %v1293_v24 = vpack.c.bf16 %v816_v23, %v815_v22  ;;  %v837_v10 = vld [vmem:[%s1918_s3 + $0x88] sm:$0xff]  ;;  %v839_v34 = vld [vmem:[%s1918_s3 + $0x98] sm:$0xff]  ;;  %v844_v62 = vld [vmem:[%s1918_s3 + $0xc0] sm:$0xff] }
  0x17   :  { %1340 = vmatpush3.bf16.msra.mxu1 %v1337_v49  ;;  %v830_v49 = vld [vmem:[%s1916_s1 + $0x178] sm:$0xff] }
  0x18   :  { %1342 = vmatprep.subr.bf16.mxu1 %v1341_v58  ;;  %v1321_v51 = vpack.c.bf16 %v830_v49, %v829_v47  ;;  %v841_v47 = vld [vmem:[%s1918_s3 + $0xa8] sm:$0xff]  ;;  %v843_v52 = vld [vmem:[%s1918_s3 + $0xb8] sm:$0xff] }
  0x19   :  { %1252 = vmatpush3.bf16.msra.mxu0 %v1249_v26  ;;  %v818_v26 = vld [vmem:[%s1916_s1 + $0x118] sm:$0xff] }
  0x1a   :  { %1254 = vmatprep.subr.bf16.mxu0 %v1253_v37  ;;  %v1297_v27 = vpack.c.bf16 %v818_v26, %v817_v25 }
  0x1b   :  { %1344 = vmatpush3.bf16.msra.mxu1 %v1341_v58  ;;  %v54_v58 = vand.u32 15, %v28_v54 }
  0x1d   :  { %1256 = vmatpush3.bf16.msra.mxu0 %v1253_v37  ;;  %v823_v37 = vld [vmem:[%s1916_s1 + $0x140] sm:$0xff]  ;;  %vm1723_vm5 = vcmp.ne.s32.totalorder %v54_v58, 15 }
  0x1e   :  { %1258 = vmatprep.subr.bf16.mxu0 %v1257_v43  ;;  %v1309_v39 = vpack.c.bf16 %v824_v38, %v823_v37 }
  0x21   :  { %1260 = vmatpush3.bf16.msra.mxu0 %v1257_v43  ;;  %v827_v43 = vld [vmem:[%s1916_s1 + $0x160] sm:$0xff] }
  0x22   :  { %1262 = vmatprep.subr.bf16.mxu0 %v1261_v53  ;;  %v1317_v46 = vpack.c.bf16 %v828_v45, %v827_v43 }
  0x24   :  { %1034 = vmatmul.mubr.f32.vlgmr.msra.gmra.mrb[0].mxu0 %v109_v59 }
  0x25   :  { %1264 = vmatpush3.bf16.msra.mxu0 %v1261_v53  ;;  %1036 = vmatprep.mubr.msk.f32.mxu0 %vm1604_vm2, %v108_v61  ;;  %v303_v53 = vrot.slane %v1582_v48, 1 }
  0x26   :  { %1266 = vmatprep.subr.bf16.mxu0 %v1265_v60 }
  0x27   :  { %v307_v56 = vsel %vm305_vm3, %v302_v29, %v303_v53  ;;  %v306_v59 = vsel %vm305_vm3, %v303_v53, %v304_v55  ;;  %v845_v53 = vld [vmem:[%s1918_s3 + $0xc8] sm:$0xff] }
  0x28   :  { %1037 = vmatmul.mubr.f32.gmra.mrb[2].mxu0 %v107_v1  ;;  %v1345_v1 = vpack.c.bf16 %v475_v0, %v474_v63  ;;  %v1373_v54 = vpack.c.bf16 %v845_v53, %v844_v62  ;;  %v850_v0 = vld [vmem:[%s1918_s3 + $0xf0] sm:$0xff] }
  0x29   :  { %1268 = vmatpush3.bf16.msra.mxu0 %v1265_v60  ;;  %1071 = vmatprep.mubr.f32.mxu0 %v1491_v12  ;;  %v309_v60 = vsel %vm305_vm3, %v304_v55, %v301_v28  ;;  %v846_v55 = vld [vmem:[%s1918_s3 + $0xd0] sm:$0xff] }
  0x2a   :  { %1270 = vmatprep.subr.bf16.mxu0 %v1269_v2  ;;  %1346 = vmatprep.subr.bf16.mxu1 %v1345_v1 }
  0x2b   :  { %1348 = vmatpush3.bf16.msra.mxu1 %v1345_v1  ;;  %v851_v1 = vld [vmem:[%s1918_s3 + $0xf8] sm:$0xff] }
  0x2d   :  { %1272 = vmatpush3.bf16.msra.mxu0 %v1269_v2  ;;  %v476_v2 = vld [vmem:[%s1918_s3 + $0x60] sm:$0xff] }
  0x2e   :  { %1274 = vmatprep.subr.bf16.mxu0 %v1273_v5  ;;  %v1349_v4 = vpack.c.bf16 %v477_v3, %v476_v2  ;;  %v1385_v2 = vpack.c.bf16 %v851_v1, %v850_v0  ;;  %v856_v3 = vld [vmem:[%s1918_s3 + $0x100] sm:$0xff] }
  0x30   :  { %1350 = vmatprep.subr.bf16.mxu1 %v1349_v4 }
  0x31   :  { %1276 = vmatpush3.bf16.msra.mxu0 %v1273_v5  ;;  %1352 = vmatpush3.bf16.msra.mxu1 %v1349_v4  ;;  %v478_v5 = vld [vmem:[%s1918_s3 + $0x70] sm:$0xff]  ;;  %v857_v4 = vld [vmem:[%s1918_s3 + $0x108] sm:$0xff] }
  0x32   :  { %1278 = vmatprep.subr.bf16.mxu0 %v1277_v9  ;;  %v1353_v8 = vpack.c.bf16 %v479_v7, %v478_v5  ;;  %v1389_v5 = vpack.c.bf16 %v857_v4, %v856_v3  ;;  %v858_v7 = vld [vmem:[%s1918_s3 + $0x110] sm:$0xff] }
  0x34   :  { %1354 = vmatprep.subr.bf16.mxu1 %v1353_v8 }
  0x35   :  { %1280 = vmatpush3.bf16.msra.mxu0 %v1277_v9  ;;  %1356 = vmatpush3.bf16.msra.mxu1 %v1353_v8  ;;  %v836_v9 = vld [vmem:[%s1918_s3 + $0x80] sm:$0xff]  ;;  %v859_v8 = vld [vmem:[%s1918_s3 + $0x118] sm:$0xff] }
  0x36   :  { %1282 = vmatprep.subr.bf16.mxu0 %v1281_v14  ;;  %v1357_v11 = vpack.c.bf16 %v837_v10, %v836_v9  ;;  %v1393_v9 = vpack.c.bf16 %v859_v8, %v858_v7  ;;  %v860_v10 = vld [vmem:[%s1918_s3 + $0x120] sm:$0xff] }
  0x38   :  { %1358 = vmatprep.subr.bf16.mxu1 %v1357_v11 }
  0x39   :  { %1284 = vmatpush3.bf16.msra.mxu0 %v1281_v14  ;;  %v835_v14 = vld [vmem:[%s1919_s2] ss:$0 sm:$0xff] }
  0x3a   :  { %1286 = vmatprep.subr.bf16.mxu0 %v1285_v17 }
  0x3d   :  { %1288 = vmatpush3.bf16.msra.mxu0 %v1285_v17 }
  0x3e   :  { %1290 = vmatprep.subr.bf16.mxu0 %v1289_v21 }
  0x41   :  { %1292 = vmatpush3.bf16.msra.mxu0 %v1289_v21 }
  0x42   :  { %1294 = vmatprep.subr.bf16.mxu0 %v1293_v24 }
  0x44   :  { %1072 = vmatmul.mubr.f32.vlgmr.msra.gmra.mrb[0].mxu0 %v1570_v44 }
  0x45   :  { %1296 = vmatpush3.bf16.msra.mxu0 %v1293_v24  ;;  %1074 = vmatprep.mubr.f32.mxu0 %v1582_v48 }
  0x46   :  { %1298 = vmatprep.subr.bf16.mxu0 %v1297_v27 }
  0x48   :  { %1075 = vmatmul.mubr.f32.gmra.mrb[2].mxu0 %v1496_v13 }
  0x49   :  { %1300 = vmatpush3.bf16.msra.mxu0 %v1297_v27  ;;  %1109 = vmatprep.mubr.f32.mxu0 %v308_v33  ;;  %v838_v33 = vld [vmem:[%s1918_s3 + $0x90] sm:$0xff] }
  0x4a   :  { %1302 = vmatprep.subr.bf16.mxu0 %v1301_v32  ;;  %v1361_v41 = vpack.c.bf16 %v839_v34, %v838_v33 }
  0x4d   :  { %1304 = vmatpush3.bf16.msra.mxu0 %v1301_v32 }
  0x4e   :  { %1306 = vmatprep.subr.bf16.mxu0 %v1305_v36 }
  0x51   :  { %1308 = vmatpush3.bf16.msra.mxu0 %v1305_v36 }
  0x52   :  { %1310 = vmatprep.subr.bf16.mxu0 %v1309_v39 }
  0x55   :  { %1312 = vmatpush3.bf16.msra.mxu0 %v1309_v39 }
  0x56   :  { %1314 = vmatprep.subr.bf16.mxu0 %v1313_v42 }
  0x59   :  { %1316 = vmatpush3.bf16.msra.mxu0 %v1313_v42 }
  0x5a   :  { %1318 = vmatprep.subr.bf16.mxu0 %v1317_v46 }
  0x5d   :  { %1320 = vmatpush3.bf16.msra.mxu0 %v1317_v46  ;;  %v840_v46 = vld [vmem:[%s1918_s3 + $0xa0] sm:$0xff] }
  0x5e   :  { %1322 = vmatprep.subr.bf16.mxu0 %v1321_v51  ;;  %v1365_v50 = vpack.c.bf16 %v841_v47, %v840_v46 }
  0x61   :  { %1324 = vmatpush3.bf16.msra.mxu0 %v1321_v51  ;;  %v842_v51 = vld [vmem:[%s1918_s3 + $0xb0] sm:$0xff] }
  0x62   :  { %v1369_v6 = vpack.c.bf16 %v843_v52, %v842_v51 }
  0x64   :  { %1110 = vmatmul.mubr.msk.f32.vlgmr.msra.gmra.mrb[0].mxu0 %vm1713_vm4, %v307_v56  ;;  %v847_v56 = vld [vmem:[%s1918_s3 + $0xd8] sm:$0xff] }
  0x65   :  { %1112 = vmatprep.mubr.f32.mxu0 %v306_v59  ;;  %v1377_v58 = vpack.c.bf16 %v847_v56, %v846_v55  ;;  %v848_v59 = vld [vmem:[%s1918_s3 + $0xe0] sm:$0xff] }
  0x68   :  { %1113 = vmatmul.mubr.msk.f32.gmra.mrb[2].mxu0 %vm1723_vm5, %v309_v60  ;;  %v849_v60 = vld [vmem:[%s1918_s3 + $0xe8] sm:$0xff] }
  0x69   :  { %v1381_v63 = vpack.c.bf16 %v849_v60, %v848_v59 }
 0x137   :  { %v1111_v15 = vpop.f32.mrb[0].mxu0 }
 0x138   :  { %v428_v16 = vadd.f32 %v1111_v15, %v835_v14  ;;  %v397_v17 = vpop.f32.mrb[1].mxu0  ;;  %v862_v15 = vld [vmem:[%s1918_s3 + $0x130] sm:$0xff] }
 0x139   :  { %v427_v19 = vadd.f32 %v835_v14, %v397_v17 }
 0x13a   :  { %v1756_v20 = vmax.f32 %v428_v16, 0.0  ;;  %v863_v16 = vld [vmem:[%s1918_s3 + $0x138] sm:$0xff] }
 0x13b   :  { %v431_v21 = vmax.f32 %v427_v19, 0.0  ;;  %v1114_v22 = vpop.f32.mrb[2].mxu0  ;;  %v1401_v17 = vpack.c.bf16 %v863_v16, %v862_v15  ;;  %v864_v19 = vld [vmem:[%s1918_s3 + $0x140] sm:$0xff] }
 0x13c   :  { %v453_v23 = vrot.slane %v1756_v20, 7  ;;  %v651_v24 = vrot.slane %v1756_v20, 1  ;;  %v430_v25 = vadd.f32 %v1114_v22, %v835_v14  ;;  %v407_v26 = vpop.f32.mrb[3].mxu0  ;;  %v866_v22 = vld [vmem:[%s1918_s3 + $0x150] sm:$0xff] }
 0x13d   :  { %v650_v27 = vrot.slane %v431_v21, 1  ;;  %v429_v28 = vadd.f32 %v835_v14, %v407_v26  ;;  %v452_v29 = vrot.slane %v431_v21, 7  ;;  %v869_v26 = vld [vmem:[%s1918_s3 + $0x168] sm:$0xff] }
 0x13e   :  { %v1760_v30 = vmax.f32 %v430_v25, 0.0  ;;  %v868_v25 = vld [vmem:[%s1918_s3 + $0x160] sm:$0xff] }
 0x13f   :  { %v1762_v31 = vmax.f32 %v429_v28, 0.0  ;;  %v458_v32 = vsel %vm106_vm0, %v452_v29, %v453_v23  ;;  %v1774_v35 = vsel %vm305_vm3, %v650_v27, %v651_v24  ;;  %v870_v28 = vld [vmem:[%s1918_s3 + $0x170] sm:$0xff] }
 0x140   :  { %v653_v36 = vrot.slane %v1760_v30, 1  ;;  %v455_v37 = vrot.slane %v1760_v30, 7 }
 0x141   :  { %v454_v38 = vrot.slane %v1762_v31, 7  ;;  %v652_v39 = vrot.slane %v1762_v31, 1 }
 0x142   :  { %v459_v40 = vsel %vm106_vm0, %v455_v37, %v452_v29  ;;  %v1784_v42 = vsel %vm305_vm3, %v653_v36, %v650_v27  ;;  %v1413_v27 = vpack.c.bf16 %v869_v26, %v868_v25  ;;  %v871_v29 = vld [vmem:[%s1918_s3 + $0x178] sm:$0xff] }
 0x143   :  { %1147 = vmatprep.mubr.msk.f32.mxu1 %vm1507_vm1, %v459_v40  ;;  %v457_v43 = vsel %vm106_vm0, %v453_v23, %v454_v38  ;;  %v456_v45 = vsel %vm106_vm0, %v454_v38, %v455_v37  ;;  %v1800_v49 = vsel %vm305_vm3, %v651_v24, %v652_v39  ;;  %v1804_v18 = vsel %vm305_vm3, %v652_v39, %v653_v36  ;;  %v867_v23 = vld [vmem:[%s1918_s3 + $0x158] sm:$0xff] }
 0x144   :  { %1148 = vmatmul.mubr.f32.vlgmr.msra.gmra.mrb[0].mxu1 %v458_v32  ;;  %v1409_v24 = vpack.c.bf16 %v867_v23, %v866_v22 }
 0x145   :  { %1360 = vmatpush3.bf16.msra.mxu1 %v1357_v11  ;;  %1150 = vmatprep.mubr.msk.f32.mxu1 %vm1604_vm2, %v457_v43  ;;  %v861_v11 = vld [vmem:[%s1918_s3 + $0x128] sm:$0xff] }
 0x146   :  { %1362 = vmatprep.subr.bf16.mxu1 %v1361_v41  ;;  %v1397_v14 = vpack.c.bf16 %v861_v11, %v860_v10 }
 0x148   :  { %1151 = vmatmul.mubr.f32.gmra.mrb[2].mxu1 %v456_v45 }
 0x149   :  { %1364 = vmatpush3.bf16.msra.mxu1 %v1361_v41  ;;  %1185 = vmatprep.mubr.f32.mxu1 %v431_v21 }
 0x14a   :  { %1366 = vmatprep.subr.bf16.mxu1 %v1365_v50 }
 0x14d   :  { %1368 = vmatpush3.bf16.msra.mxu1 %v1365_v50 }
 0x14e   :  { %1370 = vmatprep.subr.bf16.mxu1 %v1369_v6 }
 0x151   :  { %1372 = vmatpush3.bf16.msra.mxu1 %v1369_v6 }
 0x152   :  { %1374 = vmatprep.subr.bf16.mxu1 %v1373_v54 }
 0x155   :  { %1376 = vmatpush3.bf16.msra.mxu1 %v1373_v54 }
 0x156   :  { %1378 = vmatprep.subr.bf16.mxu1 %v1377_v58 }
 0x159   :  { %1380 = vmatpush3.bf16.msra.mxu1 %v1377_v58 }
 0x15a   :  { %1382 = vmatprep.subr.bf16.mxu1 %v1381_v63 }
 0x15d   :  { %1384 = vmatpush3.bf16.msra.mxu1 %v1381_v63 }
 0x15e   :  { %1386 = vmatprep.subr.bf16.mxu1 %v1385_v2 }
 0x161   :  { %1388 = vmatpush3.bf16.msra.mxu1 %v1385_v2 }
 0x162   :  { %1390 = vmatprep.subr.bf16.mxu1 %v1389_v5 }
 0x164   :  { %1186 = vmatmul.mubr.f32.vlgmr.msra.gmra.mrb[0].mxu1 %v1756_v20  ;;  %v865_v20 = vld [vmem:[%s1918_s3 + $0x148] sm:$0xff] }
 0x165   :  { %1188 = vmatprep.mubr.f32.mxu1 %v1762_v31  ;;  %1392 = vmatpush3.bf16.msra.mxu1 %v1389_v5  ;;  %v1405_v21 = vpack.c.bf16 %v865_v20, %v864_v19  ;;  %v876_v31 = vld [vmem:[%s1920_s4] ss:$0 sm:$0xff] }
 0x166   :  { %1394 = vmatprep.subr.bf16.mxu1 %v1393_v9 }
 0x168   :  { %1189 = vmatmul.mubr.f32.gmra.mrb[2].mxu1 %v1760_v30  ;;  %v1417_v30 = vpack.c.bf16 %v871_v29, %v870_v28 }
 0x169   :  { %1396 = vmatpush3.bf16.msra.mxu1 %v1393_v9  ;;  %1223 = vmatprep.mubr.f32.mxu1 %v1774_v35 }
 0x16a   :  { %1398 = vmatprep.subr.bf16.mxu1 %v1397_v14 }
 0x16d   :  { %1400 = vmatpush3.bf16.msra.mxu1 %v1397_v14 }
 0x16e   :  { %1402 = vmatprep.subr.bf16.mxu1 %v1401_v17 }
 0x171   :  { %1404 = vmatpush3.bf16.msra.mxu1 %v1401_v17 }
 0x172   :  { %1406 = vmatprep.subr.bf16.mxu1 %v1405_v21 }
 0x175   :  { %1408 = vmatpush3.bf16.msra.mxu1 %v1405_v21 }
 0x176   :  { %1410 = vmatprep.subr.bf16.mxu1 %v1409_v24 }
 0x179   :  { %1412 = vmatpush3.bf16.msra.mxu1 %v1409_v24 }
 0x17a   :  { %1414 = vmatprep.subr.bf16.mxu1 %v1413_v27 }
 0x17d   :  { %1416 = vmatpush3.bf16.msra.mxu1 %v1413_v27 }
 0x17e   :  { %1418 = vmatprep.subr.bf16.mxu1 %v1417_v30 }
 0x181   :  { %1420 = vmatpush3.bf16.msra.mxu1 %v1417_v30 }
 0x184   :  { %1224 = vmatmul.mubr.msk.f32.vlgmr.msra.gmra.mrb[0].mxu1 %vm1713_vm4, %v1800_v49 }
 0x185   :  { %1226 = vmatprep.mubr.f32.mxu1 %v1804_v18 }
 0x188   :  { %1227 = vmatmul.mubr.msk.f32.gmra.mrb[2].mxu1 %vm1723_vm5, %v1784_v42 }
 0x257   :  { %v1225_v32 = vpop.f32.mrb[0].mxu1 }
 0x258   :  { %v776_v33 = vadd.f32 %v1225_v32, %v876_v31  ;;  %v745_v34 = vpop.f32.mrb[1].mxu1 }
 0x259   :  { %v775_v35 = vadd.f32 %v876_v31, %v745_v34 }
 0x25a   :  { %v780_v36 = vmax.f32 %v776_v33, 0.0 }
 0x25b   :  { %v779_v37 = vmax.f32 %v775_v35, 0.0  ;;  %v1228_v38 = vpop.f32.mrb[2].mxu1 }
 0x25c   :  { %v784_v57 = vadd.f32 %v780_v36, %v1570_v44  ;;  %v778_v39 = vadd.f32 %v1228_v38, %v876_v31  ;;  %v755_v40 = vpop.f32.mrb[3].mxu1 }
 0x25d   :  { %v783_v41 = vadd.f32 %v779_v37, %v1491_v12  ;;  %v777_v43 = vadd.f32 %v876_v31, %v755_v40 }
 0x25e   :  { %788 = vst [vmem:[%s1921_s5 + $0x8] sm:$0xff] %v784_v57  ;;  %v782_v61 = vmax.f32 %v778_v39, 0.0 }
 0x25f   :  { %787 = vst [vmem:[%s1921_s5] sm:$0xff] %v783_v41  ;;  %v781_v42 = vmax.f32 %v777_v43, 0.0 }
 0x260   :  { %v786_v45 = vadd.f32 %v782_v61, %v1496_v13 }
 0x261   :  { %v785_v46 = vadd.f32 %v781_v42, %v1582_v48 }
 0x262   :  { %790 = vst [vmem:[%s1921_s5 + $0x18] sm:$0xff] %v786_v45 }
 0x263   :  { %789 = vst [vmem:[%s1921_s5 + $0x10] sm:$0xff] %v785_v46 }

</bundles_post_ra>
